<compile_context>
chip_gen: v7x
topology: tpu7x:2x2x1
jax: 0.10.0
libtpu: 0.0.40
codegen_flags: <defaults>
</compile_context>

<pallas_src>
import functools

import jax
import jax.numpy as jnp
from jax.experimental import pallas as pl
from jax.experimental.pallas import tpu as pltpu


def _round_up(x, m):
    return ((x + m - 1) // m) * m


def decoder_kernel(x_ref, w1_ref, b1_ref, w2_ref, b2_ref, w3_ref, b3_ref,
                   o_ref, *, compute_dtype):
    # MXU operands in compute_dtype (f32 or bf16); accumulation always f32.
    x = x_ref[...].astype(compute_dtype)

    # fc1 + relu (epilogue stays f32 — v5e VPU/EUP have no bf16 path).
    h = jnp.dot(x, w1_ref[...].astype(compute_dtype),
                preferred_element_type=jnp.float32)
    h = jnp.maximum(h + b1_ref[...], 0.0)

    # fc2 + relu
    h = jnp.dot(h.astype(compute_dtype), w2_ref[...].astype(compute_dtype),
                preferred_element_type=jnp.float32)
    h = jnp.maximum(h + b2_ref[...], 0.0)

    # fc3 + sigmoid (exp on EUP, exact reciprocal; f32 epilogue).
    logits = jnp.dot(h.astype(compute_dtype), w3_ref[...].astype(compute_dtype),
                     preferred_element_type=jnp.float32)
    logits = logits + b3_ref[...]
    sig = pl.reciprocal(1.0 + jnp.exp(-logits), approx=False)

    # Lane-dense (128-multiple) unmasked store.
    o_ref[...] = sig.astype(o_ref.dtype)


def decoder_forward(x, params, *, block_b=128, compute_dtype=jnp.float32,
                    out_dtype=None):
    """x: [B, latent_dim]. params: dict with w{1,2,3} [in,out], b{1,2,3} [1,out]."""
    w1, b1 = params["w1"], params["b1"]
    w2, b2 = params["w2"], params["b2"]
    w3, b3 = params["w3"], params["b3"]

    B, latent_dim = x.shape
    output_dim = w3.shape[1]
    out_dtype = x.dtype if out_dtype is None else out_dtype

    # --- Lane-dense output: pad output features to a multiple of 128. ---
    out_pad = _round_up(output_dim, 128)
    if out_pad != output_dim:
        w3 = jnp.pad(w3, ((0, 0), (0, out_pad - output_dim)))
        b3 = jnp.pad(b3, ((0, 0), (0, out_pad - output_dim)))

    # --- Batch tiling: pick a sublane-aligned tile, pad B to a multiple. ---
    tb = max(8, min(block_b, _round_up(B, 8)))
    tb = _round_up(tb, 8)
    b_pad = _round_up(B, tb)
    if b_pad != B:
        x = jnp.pad(x, ((0, b_pad - B), (0, 0)))
    grid = (b_pad // tb,)

    kernel = functools.partial(decoder_kernel, compute_dtype=compute_dtype)

    # NOTE: at realistic VAE sizes (hidden_dim >= 1024, large tb) budget VMEM
    # explicitly via pltpu.CompilerParams(vmem_limit_bytes=...) and pick tb
    # roughly half of the v6e-tuned value on v7x (64 MiB physical VMEM).
    out = pl.pallas_call(
        kernel,
        out_shape=jax.ShapeDtypeStruct((b_pad, out_pad), out_dtype),
        grid_spec=pltpu.PrefetchScalarGridSpec(
            num_scalar_prefetch=0,
            grid=grid,
            in_specs=[
                # Activations: tiled along the batch grid axis.
                pl.BlockSpec((tb, latent_dim), lambda i: (i, 0)),
                # Weights / biases: constant index maps -> DMA'd once,
                # VMEM-resident across all grid steps.
                pl.BlockSpec(w1.shape, lambda i: (0, 0)),
                pl.BlockSpec(b1.shape, lambda i: (0, 0)),
                pl.BlockSpec(w2.shape, lambda i: (0, 0)),
                pl.BlockSpec(b2.shape, lambda i: (0, 0)),
                pl.BlockSpec(w3.shape, lambda i: (0, 0)),
                pl.BlockSpec(b3.shape, lambda i: (0, 0)),
            ],
            out_specs=pl.BlockSpec((tb, out_pad), lambda i: (i, 0)),
        ),
        compiler_params=pltpu.CompilerParams(
            # Batch axis is independent -> shard across v7x's two TCs.
            dimension_semantics=("parallel",),
        ),
    )(x, w1, b1, w2, b2, w3, b3)

    # Strip batch + lane padding outside the kernel.
    return out[:B, :output_dim]


def init_params(key, latent_dim, hidden_dim, output_dim):
    """Deterministic synthetic parameters (nn.Linear shapes, transposed)."""
    ks = jax.random.split(key, 6)

    def lin(kw, kb, fan_in, fan_out):
        bound = 1.0 / jnp.sqrt(fan_in)
        w = jax.random.uniform(kw, (fan_in, fan_out), jnp.float32, -bound, bound)
        b = jax.random.uniform(kb, (1, fan_out), jnp.float32, -bound, bound)
        return w, b

    w1, b1 = lin(ks[0], ks[1], latent_dim, hidden_dim)
    w2, b2 = lin(ks[2], ks[3], hidden_dim, hidden_dim)
    w3, b3 = lin(ks[4], ks[5], hidden_dim, output_dim)
    return dict(w1=w1, b1=b1, w2=w2, b2=b2, w3=w3, b3=b3)


def decoder_reference(x, p):
    h = jax.nn.relu(x @ p["w1"] + p["b1"])
    h = jax.nn.relu(h @ p["w2"] + p["b2"])
    return jax.nn.sigmoid(h @ p["w3"] + p["b3"])


if __name__ == "__main__":
    latent_dim, hidden_dim, output_dim = 16, 32, 64
    batch = 8

    key = jax.random.PRNGKey(0)
    k_x, k_p = jax.random.split(key)
    x = jax.random.normal(k_x, (batch, latent_dim), jnp.float32)
    params = init_params(k_p, latent_dim, hidden_dim, output_dim)
    ref = decoder_reference(x, params)

    # 1) f32 path (matches the PyTorch module's default precision).
    out = jax.block_until_ready(decoder_forward(x, params))
    assert out.shape == (batch, output_dim)
    assert jnp.allclose(out, ref, atol=1e-5, rtol=1e-5)

    # 2) Larger, non-tile-multiple batch to exercise grid tiling + padding.
    xb = jax.random.normal(k_x, (40, latent_dim), jnp.float32)
    out_b = jax.block_until_ready(decoder_forward(xb, params, block_b=16))
    assert out_b.shape == (40, output_dim)
    assert jnp.allclose(out_b, decoder_reference(xb, params), atol=1e-5, rtol=1e-5)

    # 3) bf16 MXU operands (v6e/v7x fast path), f32 accumulation + epilogue.
    out_bf16 = jax.block_until_ready(
        decoder_forward(x, params, compute_dtype=jnp.bfloat16))
    assert jnp.allclose(out_bf16, ref, atol=2e-2, rtol=2e-2)

    print("KERNEL_OK")
</pallas_src>

<mosaic_0001>
module attributes {stable_mosaic.version = 11 : i64} {
  func.func @decoder_kernel(%arg0: i32, %arg1: memref<8x16xf32, #tpu.memory_space<vmem>>, %arg2: memref<16x32xf32, #tpu.memory_space<vmem>>, %arg3: memref<1x32xf32, #tpu.memory_space<vmem>>, %arg4: memref<32x32xf32, #tpu.memory_space<vmem>>, %arg5: memref<1x32xf32, #tpu.memory_space<vmem>>, %arg6: memref<32x128xf32, #tpu.memory_space<vmem>>, %arg7: memref<1x128xf32, #tpu.memory_space<vmem>>, %arg8: memref<8x128xf32, #tpu.memory_space<vmem>>) attributes {dimension_semantics = [#tpu.dimension_semantics<parallel>], iteration_bounds = array<i64: 1>, scalar_prefetch = 0 : i64, scratch_operands = 0 : i64, tpu.core_type = #tpu.core_type<tc>, window_params = [{transform_indices = @transform_0, window_bounds = array<i64: 8, 16>}, {pipeline_mode = #tpu.pipeline_mode<synchronous>, transform_indices = @transform_1, window_bounds = array<i64: 16, 32>}, {pipeline_mode = #tpu.pipeline_mode<synchronous>, transform_indices = @transform_2, window_bounds = array<i64: 1, 32>}, {pipeline_mode = #tpu.pipeline_mode<synchronous>, transform_indices = @transform_3, window_bounds = array<i64: 32, 32>}, {pipeline_mode = #tpu.pipeline_mode<synchronous>, transform_indices = @transform_4, window_bounds = array<i64: 1, 32>}, {pipeline_mode = #tpu.pipeline_mode<synchronous>, transform_indices = @transform_5, window_bounds = array<i64: 32, 128>}, {pipeline_mode = #tpu.pipeline_mode<synchronous>, transform_indices = @transform_6, window_bounds = array<i64: 1, 128>}, {transform_indices = @transform_7, window_bounds = array<i64: 8, 128>}]} {
    %c0 = arith.constant 0 : index
    %c0_0 = arith.constant 0 : index
    %0 = vector.load %arg1[%c0, %c0_0] : memref<8x16xf32, #tpu.memory_space<vmem>>, vector<8x16xf32>
    %c0_1 = arith.constant 0 : index
    %c0_2 = arith.constant 0 : index
    %1 = vector.load %arg2[%c0_1, %c0_2] : memref<16x32xf32, #tpu.memory_space<vmem>>, vector<16x32xf32>
    %cst = arith.constant dense<0.000000e+00> : vector<8x32xf32>
    %2 = tpu.matmul %0, %1, %cst {dimension_numbers = #tpu.dot_dimension_numbers<[1], [0], [0], [1], [0, 0, 1, 1], [], []>} : vector<8x16xf32>, vector<16x32xf32>, vector<8x32xf32> -> vector<8x32xf32>
    %c0_3 = arith.constant 0 : index
    %c0_4 = arith.constant 0 : index
    %3 = vector.load %arg3[%c0_3, %c0_4] : memref<1x32xf32, #tpu.memory_space<vmem>>, vector<1x32xf32>
    %4 = vector.broadcast %3 : vector<1x32xf32> to vector<8x32xf32>
    %5 = arith.addf %2, %4 : vector<8x32xf32>
    %cst_5 = arith.constant 0.000000e+00 : f32
    %6 = vector.broadcast %cst_5 : f32 to vector<8x32xf32>
    %7 = arith.maximumf %5, %6 : vector<8x32xf32>
    %c0_6 = arith.constant 0 : index
    %c0_7 = arith.constant 0 : index
    %8 = vector.load %arg4[%c0_6, %c0_7] : memref<32x32xf32, #tpu.memory_space<vmem>>, vector<32x32xf32>
    %cst_8 = arith.constant dense<0.000000e+00> : vector<8x32xf32>
    %9 = tpu.matmul %7, %8, %cst_8 {dimension_numbers = #tpu.dot_dimension_numbers<[1], [0], [0], [1], [0, 0, 1, 1], [], []>} : vector<8x32xf32>, vector<32x32xf32>, vector<8x32xf32> -> vector<8x32xf32>
    %c0_9 = arith.constant 0 : index
    %c0_10 = arith.constant 0 : index
    %10 = vector.load %arg5[%c0_9, %c0_10] : memref<1x32xf32, #tpu.memory_space<vmem>>, vector<1x32xf32>
    %11 = vector.broadcast %10 : vector<1x32xf32> to vector<8x32xf32>
    %12 = arith.addf %9, %11 : vector<8x32xf32>
    %cst_11 = arith.constant 0.000000e+00 : f32
    %13 = vector.broadcast %cst_11 : f32 to vector<8x32xf32>
    %14 = arith.maximumf %12, %13 : vector<8x32xf32>
    %c0_12 = arith.constant 0 : index
    %c0_13 = arith.constant 0 : index
    %15 = vector.load %arg6[%c0_12, %c0_13] : memref<32x128xf32, #tpu.memory_space<vmem>>, vector<32x128xf32>
    %cst_14 = arith.constant dense<0.000000e+00> : vector<8x128xf32>
    %16 = tpu.matmul %14, %15, %cst_14 {dimension_numbers = #tpu.dot_dimension_numbers<[1], [0], [0], [1], [0, 0, 1, 1], [], []>} : vector<8x32xf32>, vector<32x128xf32>, vector<8x128xf32> -> vector<8x128xf32>
    %c0_15 = arith.constant 0 : index
    %c0_16 = arith.constant 0 : index
    %17 = vector.load %arg7[%c0_15, %c0_16] : memref<1x128xf32, #tpu.memory_space<vmem>>, vector<1x128xf32>
    %18 = vector.broadcast %17 : vector<1x128xf32> to vector<8x128xf32>
    %19 = arith.addf %16, %18 : vector<8x128xf32>
    %cst_17 = arith.constant 0.000000e+00 : f32
    %20 = vector.broadcast %cst_17 : f32 to vector<8x128xf32>
    %21 = arith.subf %20, %19 : vector<8x128xf32>
    %22 = math.exp %21 : vector<8x128xf32>
    %cst_18 = arith.constant 1.000000e+00 : f32
    %23 = vector.broadcast %cst_18 : f32 to vector<8x128xf32>
    %24 = arith.addf %23, %22 : vector<8x128xf32>
    %25 = tpu.reciprocal %24 : vector<8x128xf32> -> vector<8x128xf32>
    %c0_19 = arith.constant 0 : index
    %c0_20 = arith.constant 0 : index
    %26 = vector.load %arg8[%c0_19, %c0_20] : memref<8x128xf32, #tpu.memory_space<vmem>>, vector<8x128xf32>
    tpu.vector_store %arg8[%c0_19, %c0_20], %25 {strides = array<i32>} : memref<8x128xf32, #tpu.memory_space<vmem>>, vector<8x128xf32>,
    return
  }
  func.func @transform_0(%arg0: i32) -> (i32, i32) {
    %c0_i32 = arith.constant 0 : i32
    %c0_i32_0 = arith.constant 0 : i32
    return %arg0, %c0_i32 : i32, i32
  }
  func.func @transform_1(%arg0: i32) -> (i32, i32) {
    %c0_i32 = arith.constant 0 : i32
    %c0_i32_0 = arith.constant 0 : i32
    %c0_i32_1 = arith.constant 0 : i32
    return %c0_i32, %c0_i32_0 : i32, i32
  }
  func.func @transform_2(%arg0: i32) -> (i32, i32) {
    %c0_i32 = arith.constant 0 : i32
    %c0_i32_0 = arith.constant 0 : i32
    %c0_i32_1 = arith.constant 0 : i32
    return %c0_i32, %c0_i32_0 : i32, i32
  }
  func.func @transform_3(%arg0: i32) -> (i32, i32) {
    %c0_i32 = arith.constant 0 : i32
    %c0_i32_0 = arith.constant 0 : i32
    %c0_i32_1 = arith.constant 0 : i32
    return %c0_i32, %c0_i32_0 : i32, i32
  }
  func.func @transform_4(%arg0: i32) -> (i32, i32) {
    %c0_i32 = arith.constant 0 : i32
    %c0_i32_0 = arith.constant 0 : i32
    %c0_i32_1 = arith.constant 0 : i32
    return %c0_i32, %c0_i32_0 : i32, i32
  }
  func.func @transform_5(%arg0: i32) -> (i32, i32) {
    %c0_i32 = arith.constant 0 : i32
    %c0_i32_0 = arith.constant 0 : i32
    %c0_i32_1 = arith.constant 0 : i32
    return %c0_i32, %c0_i32_0 : i32, i32
  }
  func.func @transform_6(%arg0: i32) -> (i32, i32) {
    %c0_i32 = arith.constant 0 : i32
    %c0_i32_0 = arith.constant 0 : i32
    %c0_i32_1 = arith.constant 0 : i32
    return %c0_i32, %c0_i32_0 : i32, i32
  }
  func.func @transform_7(%arg0: i32) -> (i32, i32) {
    %c0_i32 = arith.constant 0 : i32
    %c0_i32_0 = arith.constant 0 : i32
    return %arg0, %c0_i32 : i32, i32
  }
}

</mosaic_0001>

<bundles_post_ra>
// kernel: tpu_custom_call.1
= control target key start
LH: loop header
LB: loop body
LE: loop exit
PB: predicated region body
PF: predicated region fallthrough
CT: control target
= control target key end

     0   :  { %12 = vsyncpa [#allocation3], 0  ;;  %s684_s0 = inlined_call_operand.hbm [shape: f32[8,16], index: 0, kind: input, shape index: {}]   ;;  %s685_s1 = inlined_call_operand.hbm [shape: f32[16,32], index: 1, kind: input, shape index: {}]   ;;  %s686_s2 = inlined_call_operand.vmem [shape: f32[1,32], index: 2, kind: input, shape index: {}]   ;;  %s687_s3 = inlined_call_operand.hbm [shape: f32[32,32], index: 3, kind: input, shape index: {}]   ;;  %s688_s4 = inlined_call_operand.vmem [shape: f32[1,32], index: 4, kind: input, shape index: {}]   ;;  %s689_s5 = inlined_call_operand.hbm [shape: f32[32,128], index: 5, kind: input, shape index: {}]   ;;  %s690_s6 = inlined_call_operand.vmem [shape: f32[1,128], index: 6, kind: input, shape index: {}]   ;;  %s691_s7 = inlined_call_operand.hbm [shape: f32[8,128], index: 7, kind: output, shape index: {}]  }
   0x1   :  { %13 = vsyncpa [#allocation6], 0 }
   0x2   :  { %14 = vsyncpa [#allocation9], 0 }
   0x3   :  { %15 = vsyncpa [#allocation4], 0  ;;  %s553_s24 = smov [#allocation5]   ;;  %s435_s28 = scalar_lea.hbm %s685_s1, 256 }
   0x4   :  { %s31_s25 = sshll.u32 %s553_s24, 4  ;;  %p436_p0 = scmp.ne.s32.totalorder %s685_s1, %s435_s28  ;;  %s32_s25 = int_to_ptr.vmem [resolvable:$true] %s31_s25 }
   0x5   :  { %p439_p1 = scmp.lt.u32.totalorder %s435_s28, %s685_s1 }
   0x7   :  { %p441_p2 = pnand %p439_p1, %p436_p0 }
   0x9   :  { %444 = shalt.err (!%p441_p2)
}
   0xa   :  { %s445_s10 = scalar_lea.vmem %s32_s25, 256  ;;  %p450_p4 = scmp.lt.s32.totalorder %s32_s25, %s32_s25 }
   0xb   :  { %p446_p3 = scmp.ne.s32.totalorder %s32_s25, %s445_s10  ;;  %p451_p5 = scmp.lt.s32.totalorder %s445_s10, %s445_s10 }
   0xd   :  { %p452_p6 = por %p451_p5, %p450_p4 }
   0xf   :  { %p453_p7 = pnand %p452_p6, %p446_p3 }
  0x11   :  { %456 = shalt.err (!%p453_p7)
}
  0x12   :  { %s554_s11 = smov 128   ;;  %s555_s12 = smov 8  }
  0x13   :  { %37 = dma.hbm_to_vmem [thread:$0]  %s685_s1, 256, %s32_s25, [#allocation6], %s554_s11, %s554_s11, %s555_s12  }
  0x14   :  { %s556_s15 = smov [#allocation2]   ;;  %s557_s17 = smov [#allocation7]  }
  0x15   :  { %s22_s16 = sshll.u32 %s556_s15, 4  ;;  %s45_s18 = sshll.u32 %s557_s17, 4  ;;  %s23_s16 = int_to_ptr.vmem [resolvable:$true] %s22_s16  ;;  %s46_s18 = int_to_ptr.vmem [resolvable:$true] %s45_s18 }
  0x16   :  { %s457_s21 = scalar_lea.hbm %s684_s0, 128 }
  0x17   :  { %p458_p8 = scmp.ne.s32.totalorder %s684_s0, %s457_s21  ;;  %p461_p9 = scmp.lt.u32.totalorder %s457_s21, %s684_s0 }
  0x19   :  { %p463_p10 = pnand %p461_p9, %p458_p8 }
  0x1b   :  { %466 = shalt.err (!%p463_p10)
}
  0x1c   :  { %s467_s1 = scalar_lea.vmem %s23_s16, 128  ;;  %p472_p12 = scmp.lt.s32.totalorder %s23_s16, %s23_s16 }
  0x1d   :  { %p468_p11 = scmp.ne.s32.totalorder %s23_s16, %s467_s1  ;;  %p473_p13 = scmp.lt.s32.totalorder %s467_s1, %s467_s1 }
  0x1f   :  { %p474_p0 = por %p473_p13, %p472_p12 }
  0x21   :  { %p475_p1 = pnand %p474_p0, %p468_p11 }
  0x23   :  { %478 = shalt.err (!%p475_p1)
}
  0x24   :  { %25 = dma.hbm_to_vmem [thread:$0]  %s684_s0, 128, %s23_s16, [#allocation3]  }
  0x25   :  { %s479_s30 = scalar_lea.hbm %s687_s3, 512 }
  0x26   :  { %p480_p2 = scmp.ne.s32.totalorder %s687_s3, %s479_s30  ;;  %p483_p3 = scmp.lt.u32.totalorder %s479_s30, %s687_s3 }
  0x28   :  { %p485_p4 = pnand %p483_p3, %p480_p2 }
  0x2a   :  { %488 = shalt.err (!%p485_p4)
}
  0x2b   :  { %s489_s14 = scalar_lea.vmem %s46_s18, 512  ;;  %p494_p6 = scmp.lt.s32.totalorder %s46_s18, %s46_s18 }
  0x2c   :  { %p490_p5 = scmp.ne.s32.totalorder %s46_s18, %s489_s14  ;;  %p495_p7 = scmp.lt.s32.totalorder %s489_s14, %s489_s14 }
  0x2e   :  { %p496_p8 = por %p495_p7, %p494_p6 }
  0x30   :  { %p497_p9 = pnand %p496_p8, %p490_p5 }
  0x32   :  { %500 = shalt.err (!%p497_p9)
}
  0x33   :  { %51 = dma.hbm_to_vmem [thread:$0]  %s687_s3, 512, %s46_s18, [#allocation6], %s554_s11, %s554_s11, %s555_s12  }
  0x34   :  { %s558_s16 = smov [#allocation8]   ;;  %s501_s21 = scalar_lea.hbm %s689_s5, 512 }
  0x35   :  { %s59_s17 = sshll.u32 %s558_s16, 4  ;;  %p502_p10 = scmp.ne.s32.totalorder %s689_s5, %s501_s21  ;;  %s60_s17 = int_to_ptr.vmem [resolvable:$true] %s59_s17 }
  0x36   :  { %p505_p11 = scmp.lt.u32.totalorder %s501_s21, %s689_s5 }
  0x38   :  { %p507_p12 = pnand %p505_p11, %p502_p10 }
  0x3a   :  { %510 = shalt.err (!%p507_p12)
}
  0x3b   :  { %s511_s1 = scalar_lea.vmem %s60_s17, 512  ;;  %p516_p0 = scmp.lt.s32.totalorder %s60_s17, %s60_s17 }
  0x3c   :  { %p512_p13 = scmp.ne.s32.totalorder %s60_s17, %s511_s1  ;;  %p517_p1 = scmp.lt.s32.totalorder %s511_s1, %s511_s1 }
  0x3e   :  { %p518_p2 = por %p517_p1, %p516_p0 }
  0x40   :  { %p519_p3 = pnand %p518_p2, %p512_p13 }
  0x42   :  { %522 = shalt.err (!%p519_p3)
}
  0x43   :  { %65 = dma.hbm_to_vmem [thread:$0]  %s689_s5, 512, %s60_s17, [#allocation9], %s554_s11, %s554_s11, %s555_s12  }
  0x44   :  { %545 = dma.done.wait [#allocation3], 128  }
  0x45   :  { %546 = vsyncadd [#allocation3], 4294967168 }
  0x46   :  { %547 = dma.done.wait [#allocation6], 768  }
  0x47   :  { %548 = vsyncadd [#allocation6], 4294966528 }
  0x48   :  { %549 = dma.done.wait [#allocation9], 512  }
  0x49   :  { %550 = vsyncadd [#allocation9], 4294966784  ;;  %v559_v0 = vmov 0.0|0.0   ;;  %vm560_vm0 = vmmov 0   ;;  %v561_v1 = vmov 0.0   ;;  %v81_v2 = vld [vmem:[#allocation5] sm:$0xff] }
  0x4a   :  { %406 = vmatprep.subr.bf16.mxu0 %v559_v0  ;;  %381 = vmatprep.mubr.msk.f32.mxu0 %vm560_vm0, %v561_v1  ;;  %v82_v3 = vld [vmem:[#allocation5 + $0x8] sm:$0xff]  ;;  %v165_v5 = vld [vmem:[#allocation7] sm:$0xff]  ;;  %v166_v6 = vld [vmem:[#allocation7 + $0x8] sm:$0xff]  ;;  %vm90_vm1 = vcmask 130048   ;;  %vm176_vm2 = vcmask 261120   ;;  %s562_s28 = smov [#allocation10]  }
  0x4b   :  { %409 = vmatprep.subr.bf16.mxu1 %v559_v0  ;;  %392 = vmatprep.mubr.msk.f32.mxu1 %vm560_vm0, %v561_v1  ;;  %v407_v4 = vpack.c.bf16 %v82_v3, %v81_v2  ;;  %v410_v7 = vpack.c.bf16 %v166_v6, %v165_v5  ;;  %v80_v8 = vld [vmem:[#allocation2] sm:$0xff]  ;;  %v167_v9 = vld [vmem:[#allocation7 + $0x10] sm:$0xff]  ;;  %v168_v10 = vld [vmem:[#allocation7 + $0x18] sm:$0xff] }
  0x4c   :  { %v413_v11 = vpack.c.bf16 %v168_v10, %v167_v9  ;;  %v251_v12 = vld [vmem:[#allocation8] sm:$0xff]  ;;  %v252_v13 = vld [vmem:[#allocation8 + $0x8] sm:$0xff]  ;;  %v253_v20 = vld [vmem:[#allocation8 + $0x10] sm:$0xff] }
  0x4d   :  { %408 = vmatpush3.bf16.msra.mxu0 %v407_v4  ;;  %411 = vmatpush3.bf16.msra.mxu1 %v410_v7  ;;  %v416_v14 = vpack.c.bf16 %v252_v13, %v251_v12  ;;  %v358_v15 = vld [vmem:[%s686_s2] ss:$0 sm:$0xff]  ;;  %v254_v21 = vld [vmem:[#allocation8 + $0x18] sm:$0xff] }
  0x4e   :  { %415 = vmatprep.subr.bf16.mxu0 %v559_v0  ;;  %412 = vmatprep.subr.bf16.mxu1 %v559_v0  ;;  %v419_v22 = vpack.c.bf16 %v254_v21, %v253_v20  ;;  %v360_v23 = vld [vmem:[%s688_s4] ss:$0 sm:$0xff]  ;;  %s347_s4 = sshll.u32 %s562_s28, 4  ;;  %s348_s4 = int_to_ptr.vmem [resolvable:$true] %s347_s4 }
  0x4f   :  { %v362_v28 = vld [vmem:[%s690_s6] ss:$0 sm:$0xff]  ;;  %s523_s29 = scalar_lea.vmem %s348_s4, 128  ;;  %p528_p5 = scmp.lt.s32.totalorder %s348_s4, %s348_s4 }
  0x50   :  { %382 = vmatmul.mubr.msk.f32.vlgmr.msra.gmra.mrb[0].mxu0 %vm90_vm1, %v80_v8  ;;  %p524_p4 = scmp.ne.s32.totalorder %s348_s4, %s523_s29  ;;  %p529_p6 = scmp.lt.s32.totalorder %s523_s29, %s523_s29 }
  0x51   :  { %403 = vmatprep.mubr.msk.f32.mxu0 %vm560_vm0, %v561_v1  ;;  %414 = vmatpush3.bf16.msra.mxu1 %v413_v11 }
  0x52   :  { %417 = vmatpush3.bf16.msra.mxu0 %v416_v14  ;;  %p530_p7 = por %p529_p6, %p528_p5 }
  0x53   :  { %418 = vmatprep.subr.bf16.mxu0 %v559_v0 }
  0x54   :  { %p531_p8 = pnand %p530_p7, %p524_p4 }
  0x56   :  { %420 = vmatpush3.bf16.msra.mxu0 %v419_v22 }
 0x123   :  { %v160_v16 = vpop.f32.mrb[0].mxu0 }
 0x124   :  { %v161_v17 = vadd.f32 %v358_v15, %v160_v16  ;;  %v383_v18 = vpop.f32.mrb[1].mxu0 }
 0x126   :  { %v164_v19 = vmax.f32 %v161_v17, 0.0 }
 0x128   :  { %393 = vmatmul.mubr.msk.f32.vlgmr.msra.gmra.mrb[0].mxu1 %vm176_vm2, %v164_v19 }
 0x1fb   :  { %v246_v24 = vpop.f32.mrb[0].mxu1 }
 0x1fc   :  { %v247_v25 = vadd.f32 %v360_v23, %v246_v24  ;;  %v394_v26 = vpop.f32.mrb[1].mxu1 }
 0x1fe   :  { %v250_v27 = vmax.f32 %v247_v25, 0.0 }
 0x200   :  { %404 = vmatmul.mubr.msk.f32.vlgmr.msra.gmra.mrb[2].mxu0 %vm176_vm2, %v250_v27 }
 0x2d3   :  { %v331_v29 = vpop.f32.mrb[2].mxu0 }
 0x2d4   :  { %v332_v30 = vadd.f32 %v362_v28, %v331_v29  ;;  %v405_v31 = vpop.f32.mrb[3].mxu0 }
 0x2d6   :  { %v335_v32 = vsub.f32 0.0, %v332_v30 }
 0x2d8   :  { %v336_v33 = vmul.f32 1.442695, %v335_v32 }
 0x2da   :  { %431 = vpow2.f32 %v336_v33 }
 0x2e4   :  { %v432_v34 = vpop.eup %431 }
 0x2e5   :  { %v338_v35 = vadd.f32 1.0, %v432_v34 }
 0x2e7   :  { %433 = vrcp.f32 %v338_v35 }
 0x2f1   :  { %v434_v36 = vpop.eup %433 }
 0x2f2   :  { %340 = vst [vmem:[#allocation10] sm:$0xff] %v434_v36 }
 0x2f3   :  { %534 = shalt.err (!%p531_p8)
}
 0x2f4   :  { %s535_s8 = scalar_lea.hbm %s691_s7, 128 }
 0x2f5   :  { %p536_p9 = scmp.ne.s32.totalorder %s691_s7, %s535_s8  ;;  %p539_p10 = scmp.lt.u32.totalorder %s535_s8, %s691_s7 }
 0x2f7   :  { %p541_p11 = pnand %p539_p10, %p536_p9 }
 0x2f9   :  { %544 = shalt.err (!%p541_p11)
}
 0x2fa   :  { %350 = dma.vmem_to_hbm [thread:$0]  %s348_s4, 128, %s691_s7, [#allocation4]  }
 0x2fb   :  { %551 = dma.done.wait [#allocation4], 128  }
 0x2fc   :  { %552 = vsyncadd [#allocation4], 4294967168 }
 0x2fd   :  { %354 = vsyncpa [#allocation3], 1 }
 0x2fe   :  { %355 = vsyncpa [#allocation6], 1 }
 0x2ff   :  { %356 = vsyncpa [#allocation9], 1 }
 0x300   :  { %357 = vsyncpa [#allocation4], 1 }

</bundles_post_ra>
